<compile_context>
chip_gen: v7x
topology: tpu7x:2x2x1
jax: 0.10.0
libtpu: 0.0.40
codegen_flags: <defaults>
</compile_context>

<pallas_src>
import functools

import jax
import jax.numpy as jnp
from jax.experimental import pallas as pl
from jax.experimental.pallas import tpu as pltpu


def _encoder_norm_kernel(alpha_ref, bias_ref, x_ref, o_ref, *, eps, d_model, d_padded):
    """Row-wise LayerNormalization (PyTorch semantics) on a (tile_rows, d_padded) block."""
    x = x_ref[...].astype(jnp.float32)                          # (tile_rows, d_padded)

    if d_padded != d_model:
        # Lane padding (wrapper-side) keeps stores lane-dense; mask padded lanes out
        # of the reductions so the statistics only see the real d_model features.
        lane = jax.lax.broadcasted_iota(jnp.int32, x.shape, dimension=1)
        valid = lane < d_model
        x = jnp.where(valid, x, jnp.float32(0.0))

    # Mean over lanes; fold 1/d into a multiply (no divide).
    mean = jnp.sum(x, axis=-1, keepdims=True) * jnp.float32(1.0 / d_model)
    diff = x - mean
    if d_padded != d_model:
        diff = jnp.where(valid, diff, jnp.float32(0.0))

    # torch.Tensor.std is unbiased: divide by (N - 1); eps is added to the *std*.
    # Two-pass (x - mean) form kept deliberately: E[x^2]-E[x]^2 risks cancellation.
    var = jnp.sum(diff * diff, axis=-1, keepdims=True) * jnp.float32(1.0 / (d_model - 1))
    std = jnp.sqrt(var)

    alpha = alpha_ref[0]                                        # scalar params from SMEM
    bias = bias_ref[0]

    # Per-row reciprocal (tile_rows elements) instead of a (tile_rows, d) divide.
    # approx=False keeps exact-divide numerics for the 1e-5 tolerance check.
    scale = alpha * pl.reciprocal(std + jnp.float32(eps), approx=False)
    o_ref[...] = (diff * scale + bias).astype(o_ref.dtype)


def _round_up(x, m):
    return (x + m - 1) // m * m


def _vmem_budget_bytes():
    """Per-grid-step VMEM byte budget, sized against this chip's physical VMEM."""
    cap = 64 << 20  # conservative default (v7x has 64 MiB per TensorCore)
    try:
        cap = int(getattr(pltpu.get_tpu_info(), "vmem_capacity_bytes", cap))
    except Exception:
        pass
    if cap <= (64 << 20):
        return 44 << 20   # v7x: leave headroom under 64 MiB after f32 temporaries
    return 80 << 20       # v5e / v6e: 128 MiB VMEM allows larger tiles


def _choose_tile_rows(rows, d_padded, itemsize, budget_bytes):
    """Largest row tile (multiple of the sublane count) whose total VMEM footprint
    (2x double-buffered input + 2x double-buffered output in the activation dtype,
    plus ~3 full-tile f32 temporaries) fits the budget."""
    sublane = 16 if itemsize == 2 else 8        # bf16 packs 2 rows per sublane
    per_row = 4 * d_padded * itemsize + 3 * d_padded * 4
    cap = max(sublane, (budget_bytes // per_row) // sublane * sublane)
    return int(min(cap, _round_up(rows, sublane)))


def encoder_forward(x, mask, alpha, bias, *, num_layers=2, eps=1e-6, tile_rows=None):
    """Forward pass of Encoder(layer, num_layers).

    x:    (batch, seq, d_model)
    mask: unused by the identity layers / final norm (kept for interface parity)
    alpha, bias: shape-(1,) scalar LayerNormalization parameters
    """
    del mask  # consumed only by the (unspecified) per-layer modules

    # The same `layer` instance applied num_layers times; identity stand-in.
    # TODO(synk): plug in the real encoder-block layer once its definition is provided.
    for _ in range(num_layers):
        x = x

    b, s, d = x.shape
    if d < 2:
        raise ValueError("d_model must be >= 2 for torch's unbiased std (divisor N-1).")
    rows = b * s
    itemsize = x.dtype.itemsize

    # Keep the output last dim lane-dense (multiple of 128) so stores are unmasked vst.
    d_pad = _round_up(d, 128)
    x2d = x.reshape(rows, d)
    if d_pad != d:
        # One extra pass over the slab, but avoids masked partial stores in the kernel.
        x2d = jnp.pad(x2d, ((0, 0), (0, d_pad - d)))

    budget = _vmem_budget_bytes()
    if tile_rows is None:
        tile_rows = _choose_tile_rows(rows, d_pad, itemsize, budget)

    # Ragged rows: cdiv grid + Pallas partial-block handling (norm is strictly
    # row-wise, so the tail block's invalid rows never affect valid output rows).
    grid_rows = pl.cdiv(rows, tile_rows)

    # VMEM limit: per-step footprint (+ headroom), never the full physical VMEM.
    est = 4 * tile_rows * d_pad * itemsize + 3 * tile_rows * d_pad * 4 + (2 << 20)
    vmem_limit = int(max(32 << 20, min(est, budget + (8 << 20))))

    kernel = functools.partial(_encoder_norm_kernel, eps=eps, d_model=d, d_padded=d_pad)

    cost = pl.CostEstimate(
        flops=int(6 * rows * d),
        transcendentals=int(2 * rows),                 # sqrt + reciprocal per row
        bytes_accessed=int(2 * rows * d * itemsize),   # one read + one write
    )

    out2d = pl.pallas_call(
        kernel,
        out_shape=jax.ShapeDtypeStruct((rows, d_pad), x.dtype),
        grid_spec=pltpu.PrefetchScalarGridSpec(
            num_scalar_prefetch=0,
            grid=(grid_rows,),
            in_specs=[
                pl.BlockSpec(memory_space=pltpu.SMEM),            # alpha (1,)
                pl.BlockSpec(memory_space=pltpu.SMEM),            # bias  (1,)
                pl.BlockSpec((tile_rows, d_pad), lambda i: (i, 0)),  # x tile (lane-dense)
            ],
            out_specs=pl.BlockSpec((tile_rows, d_pad), lambda i: (i, 0)),
        ),
        compiler_params=pltpu.CompilerParams(
            dimension_semantics=("parallel",),   # independent rows; shard across TCs
            vmem_limit_bytes=vmem_limit,
        ),
        cost_estimate=cost,
    )(alpha, bias, x2d)

    if d_pad != d:
        out2d = out2d[:, :d]
    return out2d.reshape(b, s, d)


if __name__ == "__main__":
    key = jax.random.PRNGKey(0)
    kx, km = jax.random.split(key)

    # d_model is a multiple of 128 so stores are lane-dense (no lane padding path).
    batch, seq, d_model = 2, 8, 128
    x = jax.random.normal(kx, (batch, seq, d_model), dtype=jnp.float32)
    mask = (jax.random.uniform(km, (batch, 1, seq, seq)) > 0.5).astype(jnp.float32)

    # Deterministic parameter init, matching nn.Parameter(torch.ones(1)/torch.zeros(1)).
    alpha = jnp.ones((1,), dtype=jnp.float32)
    bias = jnp.zeros((1,), dtype=jnp.float32)

    fwd = jax.jit(functools.partial(encoder_forward, num_layers=2, eps=1e-6))
    out = fwd(x, mask, alpha, bias)
    out = jax.block_until_ready(out)

    # Pure-JAX reference check (unbiased std, eps added to std).
    mean = jnp.mean(x, axis=-1, keepdims=True)
    std = jnp.std(x, axis=-1, keepdims=True, ddof=1)
    ref = alpha[0] * (x - mean) / (std + 1e-6) + bias[0]
    assert jnp.allclose(out, ref, atol=1e-5, rtol=1e-5), "mismatch vs reference"

    print("KERNEL_OK")
</pallas_src>

<mosaic_0001>
module attributes {stable_mosaic.version = 11 : i64} {
  func.func @_encoder_norm_kernel(%arg0: i32, %arg1: memref<1xf32, #tpu.memory_space<smem>>, %arg2: memref<1xf32, #tpu.memory_space<smem>>, %arg3: memref<16x128xf32, #tpu.memory_space<vmem>>, %arg4: memref<16x128xf32, #tpu.memory_space<vmem>>) attributes {dimension_semantics = [#tpu.dimension_semantics<parallel>], iteration_bounds = array<i64: 1>, scalar_prefetch = 0 : i64, scratch_operands = 0 : i64, tpu.core_type = #tpu.core_type<tc>, window_params = [{transform_indices = @transform_0, window_bounds = array<i64: 1>}, {transform_indices = @transform_1, window_bounds = array<i64: 1>}, {transform_indices = @transform_2, window_bounds = array<i64: 16, 128>}, {transform_indices = @transform_3, window_bounds = array<i64: 16, 128>}]} {
    %c0 = arith.constant 0 : index
    %c0_0 = arith.constant 0 : index
    %0 = vector.load %arg3[%c0, %c0_0] : memref<16x128xf32, #tpu.memory_space<vmem>>, vector<16x128xf32>
    %cst = arith.constant dense<0.000000e+00> : vector<16xf32>
    %1 = vector.multi_reduction <add>, %0, %cst [1] : vector<16x128xf32> to vector<16xf32>
    %2 = vector.shape_cast %1 : vector<16xf32> to vector<16x1xf32>
    %cst_1 = arith.constant 7.812500e-03 : f32
    %3 = vector.broadcast %cst_1 : f32 to vector<16x1xf32>
    %4 = arith.mulf %2, %3 : vector<16x1xf32>
    %5 = vector.broadcast %4 : vector<16x1xf32> to vector<16x128xf32>
    %6 = arith.subf %0, %5 : vector<16x128xf32>
    %7 = arith.mulf %6, %6 : vector<16x128xf32>
    %cst_2 = arith.constant dense<0.000000e+00> : vector<16xf32>
    %8 = vector.multi_reduction <add>, %7, %cst_2 [1] : vector<16x128xf32> to vector<16xf32>
    %9 = vector.shape_cast %8 : vector<16xf32> to vector<16x1xf32>
    %cst_3 = arith.constant 0.00787401571 : f32
    %10 = vector.broadcast %cst_3 : f32 to vector<16x1xf32>
    %11 = arith.mulf %9, %10 : vector<16x1xf32>
    %12 = math.sqrt %11 : vector<16x1xf32>
    %c0_4 = arith.constant 0 : index
    %13 = memref.load %arg1[%c0_4] : memref<1xf32, #tpu.memory_space<smem>>
    %c0_5 = arith.constant 0 : index
    %14 = memref.load %arg2[%c0_5] : memref<1xf32, #tpu.memory_space<smem>>
    %cst_6 = arith.constant 9.99999997E-7 : f32
    %15 = vector.broadcast %cst_6 : f32 to vector<16x1xf32>
    %16 = arith.addf %12, %15 : vector<16x1xf32>
    %17 = tpu.reciprocal %16 : vector<16x1xf32> -> vector<16x1xf32>
    %18 = vector.broadcast %13 : f32 to vector<16x1xf32>
    %19 = arith.mulf %18, %17 : vector<16x1xf32>
    %20 = vector.broadcast %19 : vector<16x1xf32> to vector<16x128xf32>
    %21 = arith.mulf %6, %20 : vector<16x128xf32>
    %22 = vector.broadcast %14 : f32 to vector<16x128xf32>
    %23 = arith.addf %21, %22 : vector<16x128xf32>
    %c0_7 = arith.constant 0 : index
    %c0_8 = arith.constant 0 : index
    %24 = vector.load %arg4[%c0_7, %c0_8] : memref<16x128xf32, #tpu.memory_space<vmem>>, vector<16x128xf32>
    tpu.vector_store %arg4[%c0_7, %c0_8], %23 {strides = array<i32>} : memref<16x128xf32, #tpu.memory_space<vmem>>, vector<16x128xf32>,
    return
  }
  func.func @transform_0(%arg0: i32) -> i32 {
    %c0_i32 = arith.constant 0 : i32
    %c0_i32_0 = arith.constant 0 : i32
    return %c0_i32 : i32
  }
  func.func @transform_1(%arg0: i32) -> i32 {
    %c0_i32 = arith.constant 0 : i32
    %c0_i32_0 = arith.constant 0 : i32
    return %c0_i32 : i32
  }
  func.func @transform_2(%arg0: i32) -> (i32, i32) {
    %c0_i32 = arith.constant 0 : i32
    %c0_i32_0 = arith.constant 0 : i32
    return %arg0, %c0_i32 : i32, i32
  }
  func.func @transform_3(%arg0: i32) -> (i32, i32) {
    %c0_i32 = arith.constant 0 : i32
    %c0_i32_0 = arith.constant 0 : i32
    return %arg0, %c0_i32 : i32, i32
  }
}

</mosaic_0001>

<bundles_post_ra>
// kernel: encoder_forward.1
= control target key start
LH: loop header
LB: loop body
LE: loop exit
PB: predicated region body
PF: predicated region fallthrough
CT: control target
= control target key end

     0   :  { %10 = vsyncpa [#allocation5], 0  ;;  %s216_s0 = inlined_call_operand.<no memory space> [shape: f32[1], index: 0, kind: input, shape index: {}]   ;;  %s217_s1 = inlined_call_operand.<no memory space> [shape: f32[1], index: 1, kind: input, shape index: {}]   ;;  %s218_s2 = inlined_call_operand.hbm [shape: f32[16,128], index: 2, kind: input, shape index: {}]   ;;  %s219_s3 = inlined_call_operand.hbm [shape: f32[16,128], index: 3, kind: output, shape index: {}]  }
   0x1   :  { %11 = vsyncpa [#allocation6], 0  ;;  %s156_s12 = smov [#allocation4]   ;;  %s108_s16 = scalar_lea.hbm %s218_s2, 256 }
   0x2   :  { %s21_s13 = sshll.u32 %s156_s12, 4  ;;  %p109_p0 = scmp.ne.s32.totalorder %s218_s2, %s108_s16  ;;  %s22_s13 = int_to_ptr.vmem [resolvable:$true] %s21_s13 }
   0x3   :  { %p112_p1 = scmp.lt.u32.totalorder %s108_s16, %s218_s2 }
   0x5   :  { %p114_p2 = pnand %p112_p1, %p109_p0 }
   0x7   :  { %117 = shalt.err (!%p114_p2)
}
   0x8   :  { %s118_s21 = scalar_lea.vmem %s22_s13, 256  ;;  %p123_p4 = scmp.lt.s32.totalorder %s22_s13, %s22_s13 }
   0x9   :  { %p119_p3 = scmp.ne.s32.totalorder %s22_s13, %s118_s21  ;;  %p124_p5 = scmp.lt.s32.totalorder %s118_s21, %s118_s21 }
   0xb   :  { %p125_p6 = por %p124_p5, %p123_p4 }
   0xd   :  { %p126_p7 = pnand %p125_p6, %p119_p3 }
   0xf   :  { %129 = shalt.err (!%p126_p7)
}
  0x10   :  { %s157_s22 = smov 128   ;;  %s158_s23 = smov 8  }
  0x11   :  { %27 = dma.hbm_to_vmem [thread:$0]  %s218_s2, 256, %s22_s13, [#allocation5], %s157_s22, %s157_s22, %s158_s23  }
  0x12   :  { %152 = dma.done.wait [#allocation5], 256  }
  0x13   :  { %153 = vsyncadd [#allocation5], 4294967040  ;;  %v31_v0 = vld [vmem:[#allocation4] sm:$0xff]  ;;  %v32_v1 = vld [vmem:[#allocation4 + $0x8] sm:$0xff]  ;;  %v69_v26 = vstv %s216_s0  ;;  %v74_v29 = vstv %s217_s1  ;;  %s159_s29 = smov [#allocation7]  }
  0x14   :  { %33 = vadd.xlane.f32.xlu0 %v31_v0  ;;  %s84_s30 = sshll.u32 %s159_s29, 4  ;;  %s85_s30 = int_to_ptr.vmem [resolvable:$true] %s84_s30 }
  0x15   :  { %s130_s4 = scalar_lea.vmem %s85_s30, 256  ;;  %p135_p9 = scmp.lt.s32.totalorder %s85_s30, %s85_s30 }
  0x16   :  { %p131_p8 = scmp.ne.s32.totalorder %s85_s30, %s130_s4  ;;  %p136_p10 = scmp.lt.s32.totalorder %s130_s4, %s130_s4 }
  0x18   :  { %35 = vadd.xlane.f32.xlu0 %v32_v1  ;;  %p137_p11 = por %p136_p10, %p135_p9 }
  0x1a   :  { %p138_p12 = pnand %p137_p11, %p131_p8 }
  0xa1   :  { %v34_v2 = vpop.xlane.xlu0 %33 }
  0xa2   :  { %v37_v3 = vmul.f32 0.0078125, %v34_v2 }
  0xa4   :  { %v39_v4 = vsub.f32 %v31_v0, %v37_v3 }
  0xa5   :  { %v36_v5 = vpop.xlane.xlu0 %35 }
  0xa6   :  { %v38_v6 = vmul.f32 0.0078125, %v36_v5  ;;  %v41_v7 = vmul.f32 %v39_v4, %v39_v4 }
  0xa8   :  { %v40_v8 = vsub.f32 %v32_v1, %v38_v6  ;;  %43 = vadd.xlane.f32.xlu1 %v41_v7 }
  0xaa   :  { %v42_v9 = vmul.f32 %v40_v8, %v40_v8 }
  0xac   :  { %45 = vadd.xlane.f32.xlu1 %v42_v9 }
 0x135   :  { %v44_v10 = vpop.xlane.xlu1 %43 }
 0x136   :  { %v47_v11 = vmul.f32 0.007874016, %v44_v10 }
 0x138   :  { %100 = vrsqrt.f32 %v47_v11  ;;  %vm51_vm0 = vcmp.eq.f32.partialorder %v47_v11, inf  ;;  %v54_v16 = vand.u32 2147483648, %v47_v11  ;;  %vm53_vm1 = vcmp.eq.f32.partialorder %v47_v11, 0.0 }
 0x139   :  { %v46_v12 = vpop.xlane.xlu1 %45 }
 0x13a   :  { %v48_v13 = vmul.f32 0.007874016, %v46_v12 }
 0x13c   :  { %102 = vrsqrt.f32 %v48_v13  ;;  %vm58_vm2 = vcmp.eq.f32.partialorder %v48_v13, inf  ;;  %v61_v22 = vand.u32 2147483648, %v48_v13  ;;  %vm60_vm3 = vcmp.eq.f32.partialorder %v48_v13, 0.0 }
 0x142   :  { %v101_v14 = vpop.eup %100 }
 0x143   :  { %v50_v15 = vmul.f32 %v101_v14, %v47_v11 }
 0x145   :  { %v52_v17 = vsel %vm51_vm0, %v47_v11, %v50_v15 }
 0x146   :  { %v103_v18 = vpop.eup %102  ;;  %v55_v19 = vsel %vm53_vm1, %v54_v16, %v52_v17 }
 0x147   :  { %v57_v20 = vmul.f32 %v103_v18, %v48_v13  ;;  %v65_v21 = vadd.f32 1e-06, %v55_v19 }
 0x149   :  { %v59_v23 = vsel %vm58_vm2, %v48_v13, %v57_v20  ;;  %104 = vrcp.f32 %v65_v21 }
 0x14a   :  { %v62_v24 = vsel %vm60_vm3, %v61_v22, %v59_v23 }
 0x14b   :  { %v66_v25 = vadd.f32 1e-06, %v62_v24 }
 0x14d   :  { %106 = vrcp.f32 %v66_v25 }
 0x153   :  { %v105_v27 = vpop.eup %104 }
 0x154   :  { %v70_v28 = vmul.f32 %v105_v27, %v69_v26 }
 0x156   :  { %v72_v30 = vmul.f32 %v70_v28, %v39_v4 }
 0x157   :  { %v107_v31 = vpop.eup %106 }
 0x158   :  { %v71_v32 = vmul.f32 %v107_v31, %v69_v26  ;;  %v75_v33 = vadd.f32 %v74_v29, %v72_v30 }
 0x15a   :  { %v73_v34 = vmul.f32 %v71_v32, %v40_v8  ;;  %77 = vst [vmem:[#allocation7] sm:$0xff] %v75_v33 }
 0x15c   :  { %v76_v35 = vadd.f32 %v74_v29, %v73_v34 }
 0x15e   :  { %78 = vst [vmem:[#allocation7 + $0x8] sm:$0xff] %v76_v35 }
 0x15f   :  { %141 = shalt.err (!%p138_p12)
}
 0x160   :  { %s142_s5 = scalar_lea.hbm %s219_s3, 256 }
 0x161   :  { %p143_p13 = scmp.ne.s32.totalorder %s219_s3, %s142_s5  ;;  %p146_p0 = scmp.lt.u32.totalorder %s142_s5, %s219_s3 }
 0x163   :  { %p148_p1 = pnand %p146_p0, %p143_p13 }
 0x165   :  { %151 = shalt.err (!%p148_p1)
}
 0x166   :  { %90 = dma.vmem_to_hbm [thread:$0]  %s85_s30, 256, %s219_s3, [#allocation6], %s157_s22, %s157_s22, %s158_s23  }
 0x167   :  { %154 = dma.done.wait [#allocation6], 256  }
 0x168   :  { %155 = vsyncadd [#allocation6], 4294967040 }
 0x169   :  { %94 = vsyncpa [#allocation5], 1 }
 0x16a   :  { %95 = vsyncpa [#allocation6], 1 }

</bundles_post_ra>
